<compile_context>
chip_gen: v6e
topology: v6e:2x2x1
jax: 0.10.0
libtpu: 0.0.40
codegen_flags: <defaults>
</compile_context>

<pallas_src>
import jax
import jax.numpy as jnp
from jax.experimental import pallas as pl
from jax.experimental.pallas import tpu as pltpu

FEAT_DIM = 2048     # resnet50 fc.in_features
HIDDEN = 3          # fc1 out_features
OUT = 3             # fc2 out_features
LANE = 128          # lane-dense padding for the tiny (->3) head dims
W2_SUB = 8          # sublane-padded rows for the 3x3 fc2 weight
TILE_B_MAX = 512    # rows per grid step (multiple of 8; ~2 MiB bf16 per tile)


def _round_up(n, m):
    return (n + m - 1) // m * m


def head_kernel(f_ref, w1_ref, b1_ref, w2_ref, b2_ref, o_ref):
    """fc2(relu(fc1(features))) for one (TILE_B, 2048) bf16 feature tile."""
    f = f_ref[...]                                                # (tb, 2048) bf16
    # fc1: lane-dense MXU matmul (columns >= HIDDEN of w1 are zero).
    h = jnp.dot(f, w1_ref[...], preferred_element_type=jnp.float32)
    h = jnp.maximum(h + b1_ref[...], 0.0)                         # (tb, 128) f32

    # fc2 (3x3): VPU broadcast multiply-adds, no second MXU pass.
    w2 = w2_ref[...]                                              # (8, 128) f32
    o = (h[:, 0:1] * w2[0:1, :]
         + h[:, 1:2] * w2[1:2, :]
         + h[:, 2:3] * w2[2:3, :]
         + b2_ref[...])                                           # (tb, 128) f32
    o_ref[...] = o.astype(o_ref.dtype)


def network_head(features, w1, b1, w2, b2):
    """features: (B, 2048) f32 -> (B, 3) f32, head computed in one Pallas call.

    The feature stream is tiled along the batch dim so BlockSpec pipelining
    double-buffers the HBM->VMEM DMA; weights/biases use constant index maps
    and stay VMEM-resident across the grid.
    """
    B = features.shape[0]
    tile_b = min(TILE_B_MAX, _round_up(B, 8))
    b_pad = _round_up(B, tile_b)

    f_bf16 = features.astype(jnp.bfloat16)          # halve HBM feature traffic
    if b_pad != B:
        f_bf16 = jnp.pad(f_bf16, ((0, b_pad - B), (0, 0)))

    # Lane-dense padded weights / biases (zeros past the 3 live columns/rows).
    w1_pad = jnp.zeros((FEAT_DIM, LANE), jnp.bfloat16).at[:, :HIDDEN].set(
        w1.astype(jnp.bfloat16))
    b1_pad = jnp.zeros((1, LANE), jnp.float32).at[0, :HIDDEN].set(b1)
    w2_pad = jnp.zeros((W2_SUB, LANE), jnp.float32).at[:HIDDEN, :OUT].set(w2)
    b2_pad = jnp.zeros((1, LANE), jnp.float32).at[0, :OUT].set(b2)

    out = pl.pallas_call(
        head_kernel,
        out_shape=jax.ShapeDtypeStruct((b_pad, LANE), jnp.float32),
        grid=(b_pad // tile_b,),
        in_specs=[
            pl.BlockSpec((tile_b, FEAT_DIM), lambda i: (i, 0)),
            pl.BlockSpec((FEAT_DIM, LANE), lambda i: (0, 0)),
            pl.BlockSpec((1, LANE), lambda i: (0, 0)),
            pl.BlockSpec((W2_SUB, LANE), lambda i: (0, 0)),
            pl.BlockSpec((1, LANE), lambda i: (0, 0)),
        ],
        out_specs=pl.BlockSpec((tile_b, LANE), lambda i: (i, 0)),
        compiler_params=pltpu.CompilerParams(
            dimension_semantics=("parallel",)),
    )(f_bf16, w1_pad, b1_pad, w2_pad, b2_pad)
    return out[:B, :OUT]


def backbone_features(x, proj_w):
    """Deterministic stand-in for the frozen ResNet50 backbone (plain JAX).

    Global-average-pools the NCHW input over spatial dims and projects the
    pooled channels to the 2048-dim feature space resnet50 would produce.
    """
    pooled = jnp.mean(x, axis=(2, 3))          # (B, C)
    feats = pooled @ proj_w                    # (B, 2048)
    return feats.astype(jnp.float32)


def network_forward(x, params):
    feats = backbone_features(x, params["proj_w"])
    return network_head(feats, params["w1"], params["b1"],
                        params["w2"], params["b2"])


def head_reference(features, w1, b1, w2, b2):
    """Pure-JAX reference matching the kernel's bf16 feature/weight rounding."""
    f = features.astype(jnp.bfloat16).astype(jnp.float32)
    w1f = w1.astype(jnp.bfloat16).astype(jnp.float32)
    h = jnp.maximum(f @ w1f + b1, 0.0)
    return h @ w2 + b2


def init_params(key, in_channels):
    k_proj, k_w1, k_b1, k_w2, k_b2 = jax.random.split(key, 5)
    proj_w = jax.random.normal(k_proj, (in_channels, FEAT_DIM),
                               dtype=jnp.float32) * 0.02
    # nn.Linear-style init (scaled uniform), deterministic.
    w1 = jax.random.uniform(k_w1, (FEAT_DIM, HIDDEN), jnp.float32,
                            -1.0, 1.0) * (1.0 / FEAT_DIM ** 0.5)
    b1 = jax.random.uniform(k_b1, (HIDDEN,), jnp.float32,
                            -1.0, 1.0) * (1.0 / FEAT_DIM ** 0.5)
    w2 = jax.random.uniform(k_w2, (HIDDEN, OUT), jnp.float32,
                            -1.0, 1.0) * (1.0 / HIDDEN ** 0.5)
    b2 = jax.random.uniform(k_b2, (OUT,), jnp.float32,
                            -1.0, 1.0) * (1.0 / HIDDEN ** 0.5)
    return {"proj_w": proj_w, "w1": w1, "b1": b1, "w2": w2, "b2": b2}


if __name__ == "__main__":
    key = jax.random.PRNGKey(0)
    k_params, k_x, k_big = jax.random.split(key, 3)

    # Small end-to-end example: NCHW 3-channel image input, batch 2.
    B, C, H, W = 2, 3, 16, 16
    x = jax.random.normal(k_x, (B, C, H, W), dtype=jnp.float32)
    params = init_params(k_params, C)

    out = network_forward(x, params)
    out = jax.block_until_ready(out)
    assert out.shape == (B, OUT), out.shape

    feats = backbone_features(x, params["proj_w"])
    ref = head_reference(feats, params["w1"], params["b1"],
                         params["w2"], params["b2"])
    assert jnp.allclose(out, ref, atol=1e-3, rtol=1e-3)

    # Multi-tile check: B > TILE_B_MAX exercises the batch-tiled grid and the
    # ragged-tail padding path.
    B2 = 520
    feats2 = jax.random.normal(k_big, (B2, FEAT_DIM), dtype=jnp.float32) * 0.01
    out2 = network_head(feats2, params["w1"], params["b1"],
                        params["w2"], params["b2"])
    out2 = jax.block_until_ready(out2)
    ref2 = head_reference(feats2, params["w1"], params["b1"],
                          params["w2"], params["b2"])
    assert out2.shape == (B2, OUT), out2.shape
    assert jnp.allclose(out2, ref2, atol=1e-3, rtol=1e-3)

    print("KERNEL_OK")
</pallas_src>

<mosaic_0001>
module attributes {stable_mosaic.version = 11 : i64} {
  func.func @head_kernel(%arg0: i32, %arg1: memref<8x2048xbf16, #tpu.memory_space<vmem>>, %arg2: memref<2048x128xbf16, #tpu.memory_space<vmem>>, %arg3: memref<1x128xf32, #tpu.memory_space<vmem>>, %arg4: memref<8x128xf32, #tpu.memory_space<vmem>>, %arg5: memref<1x128xf32, #tpu.memory_space<vmem>>, %arg6: memref<8x128xf32, #tpu.memory_space<vmem>>) attributes {dimension_semantics = [#tpu.dimension_semantics<parallel>], iteration_bounds = array<i64: 1>, scalar_prefetch = 0 : i64, scratch_operands = 0 : i64, tpu.core_type = #tpu.core_type<tc>, window_params = [{transform_indices = @transform_0, window_bounds = array<i64: 8, 2048>}, {pipeline_mode = #tpu.pipeline_mode<synchronous>, transform_indices = @transform_1, window_bounds = array<i64: 2048, 128>}, {pipeline_mode = #tpu.pipeline_mode<synchronous>, transform_indices = @transform_2, window_bounds = array<i64: 1, 128>}, {pipeline_mode = #tpu.pipeline_mode<synchronous>, transform_indices = @transform_3, window_bounds = array<i64: 8, 128>}, {pipeline_mode = #tpu.pipeline_mode<synchronous>, transform_indices = @transform_4, window_bounds = array<i64: 1, 128>}, {transform_indices = @transform_5, window_bounds = array<i64: 8, 128>}]} {
    %c0 = arith.constant 0 : index
    %c0_0 = arith.constant 0 : index
    %0 = vector.load %arg1[%c0, %c0_0] : memref<8x2048xbf16, #tpu.memory_space<vmem>>, vector<8x2048xbf16>
    %c0_1 = arith.constant 0 : index
    %c0_2 = arith.constant 0 : index
    %1 = vector.load %arg2[%c0_1, %c0_2] : memref<2048x128xbf16, #tpu.memory_space<vmem>>, vector<2048x128xbf16>
    %cst = arith.constant dense<0.000000e+00> : vector<8x128xf32>
    %2 = tpu.matmul %0, %1, %cst {dimension_numbers = #tpu.dot_dimension_numbers<[1], [0], [0], [1], [0, 0, 1, 1], [], []>} : vector<8x2048xbf16>, vector<2048x128xbf16>, vector<8x128xf32> -> vector<8x128xf32>
    %c0_3 = arith.constant 0 : index
    %c0_4 = arith.constant 0 : index
    %3 = vector.load %arg3[%c0_3, %c0_4] : memref<1x128xf32, #tpu.memory_space<vmem>>, vector<1x128xf32>
    %4 = vector.broadcast %3 : vector<1x128xf32> to vector<8x128xf32>
    %5 = arith.addf %2, %4 : vector<8x128xf32>
    %cst_5 = arith.constant 0.000000e+00 : f32
    %6 = vector.broadcast %cst_5 : f32 to vector<8x128xf32>
    %7 = arith.maximumf %5, %6 : vector<8x128xf32>
    %c0_6 = arith.constant 0 : index
    %c0_7 = arith.constant 0 : index
    %8 = vector.load %arg4[%c0_6, %c0_7] : memref<8x128xf32, #tpu.memory_space<vmem>>, vector<8x128xf32>
    %9 = vector.extract_strided_slice %7 {offsets = [0, 0], sizes = [8, 1], strides = [1, 1]} : vector<8x128xf32> to vector<8x1xf32>
    %10 = vector.extract_strided_slice %8 {offsets = [0, 0], sizes = [1, 128], strides = [1, 1]} : vector<8x128xf32> to vector<1x128xf32>
    %11 = vector.broadcast %9 : vector<8x1xf32> to vector<8x128xf32>
    %12 = vector.broadcast %10 : vector<1x128xf32> to vector<8x128xf32>
    %13 = arith.mulf %11, %12 : vector<8x128xf32>
    %14 = vector.extract_strided_slice %7 {offsets = [0, 1], sizes = [8, 1], strides = [1, 1]} : vector<8x128xf32> to vector<8x1xf32>
    %15 = vector.extract_strided_slice %8 {offsets = [1, 0], sizes = [1, 128], strides = [1, 1]} : vector<8x128xf32> to vector<1x128xf32>
    %16 = vector.broadcast %14 : vector<8x1xf32> to vector<8x128xf32>
    %17 = vector.broadcast %15 : vector<1x128xf32> to vector<8x128xf32>
    %18 = arith.mulf %16, %17 : vector<8x128xf32>
    %19 = arith.addf %13, %18 : vector<8x128xf32>
    %20 = vector.extract_strided_slice %7 {offsets = [0, 2], sizes = [8, 1], strides = [1, 1]} : vector<8x128xf32> to vector<8x1xf32>
    %21 = vector.extract_strided_slice %8 {offsets = [2, 0], sizes = [1, 128], strides = [1, 1]} : vector<8x128xf32> to vector<1x128xf32>
    %22 = vector.broadcast %20 : vector<8x1xf32> to vector<8x128xf32>
    %23 = vector.broadcast %21 : vector<1x128xf32> to vector<8x128xf32>
    %24 = arith.mulf %22, %23 : vector<8x128xf32>
    %25 = arith.addf %19, %24 : vector<8x128xf32>
    %c0_8 = arith.constant 0 : index
    %c0_9 = arith.constant 0 : index
    %26 = vector.load %arg5[%c0_8, %c0_9] : memref<1x128xf32, #tpu.memory_space<vmem>>, vector<1x128xf32>
    %27 = vector.broadcast %26 : vector<1x128xf32> to vector<8x128xf32>
    %28 = arith.addf %25, %27 : vector<8x128xf32>
    %c0_10 = arith.constant 0 : index
    %c0_11 = arith.constant 0 : index
    %29 = vector.load %arg6[%c0_10, %c0_11] : memref<8x128xf32, #tpu.memory_space<vmem>>, vector<8x128xf32>
    tpu.vector_store %arg6[%c0_10, %c0_11], %28 {strides = array<i32>} : memref<8x128xf32, #tpu.memory_space<vmem>>, vector<8x128xf32>,
    return
  }
  func.func @transform_0(%arg0: i32) -> (i32, i32) {
    %c0_i32 = arith.constant 0 : i32
    %c0_i32_0 = arith.constant 0 : i32
    return %arg0, %c0_i32 : i32, i32
  }
  func.func @transform_1(%arg0: i32) -> (i32, i32) {
    %c0_i32 = arith.constant 0 : i32
    %c0_i32_0 = arith.constant 0 : i32
    %c0_i32_1 = arith.constant 0 : i32
    return %c0_i32, %c0_i32_0 : i32, i32
  }
  func.func @transform_2(%arg0: i32) -> (i32, i32) {
    %c0_i32 = arith.constant 0 : i32
    %c0_i32_0 = arith.constant 0 : i32
    %c0_i32_1 = arith.constant 0 : i32
    return %c0_i32, %c0_i32_0 : i32, i32
  }
  func.func @transform_3(%arg0: i32) -> (i32, i32) {
    %c0_i32 = arith.constant 0 : i32
    %c0_i32_0 = arith.constant 0 : i32
    %c0_i32_1 = arith.constant 0 : i32
    return %c0_i32, %c0_i32_0 : i32, i32
  }
  func.func @transform_4(%arg0: i32) -> (i32, i32) {
    %c0_i32 = arith.constant 0 : i32
    %c0_i32_0 = arith.constant 0 : i32
    %c0_i32_1 = arith.constant 0 : i32
    return %c0_i32, %c0_i32_0 : i32, i32
  }
  func.func @transform_5(%arg0: i32) -> (i32, i32) {
    %c0_i32 = arith.constant 0 : i32
    %c0_i32_0 = arith.constant 0 : i32
    return %arg0, %c0_i32 : i32, i32
  }
}

</mosaic_0001>

<bundles_post_ra>
// kernel: tpu_custom_call.1
= control target key start
LH: loop header
LB: loop body
LE: loop exit
PB: predicated region body
PF: predicated region fallthrough
CT: control target
= control target key end

     0   :  { %10 = vsyncpa [#allocation3], 0  ;;  %s2153_s0 = inlined_call_operand.hbm [shape: bf16[8,2048], index: 0, kind: input, shape index: {}]   ;;  %s2154_s1 = inlined_call_operand.hbm [shape: bf16[2048,128], index: 1, kind: input, shape index: {}]   ;;  %s2155_s2 = inlined_call_operand.vmem [shape: f32[1,128], index: 2, kind: input, shape index: {}]   ;;  %s2156_s3 = inlined_call_operand.hbm [shape: f32[8,128], index: 3, kind: input, shape index: {}]   ;;  %s2157_s4 = inlined_call_operand.vmem [shape: f32[1,128], index: 4, kind: input, shape index: {}]   ;;  %s2158_s5 = inlined_call_operand.hbm [shape: f32[8,128], index: 5, kind: output, shape index: {}]  }
   0x1   :  { %11 = vsyncpa [#allocation6], 0 }
   0x2   :  { %12 = vsyncpa [#allocation4], 0  ;;  %s2096_s18 = smov [#allocation5]  }
   0x3   :  { %s28_s19 = sshll.u32 %s2096_s18, 4  ;;  %s29_s19 = int_to_ptr.vmem [resolvable:$true] %s28_s19 }
   0x4   :  { %s2018_s20 = scalar_lea.vmem %s29_s19, 16384  ;;  %p2023_p1 = scmp.lt.s32.totalorder %s29_s19, %s29_s19 }
   0x5   :  { %p2019_p0 = scmp.ne.s32.totalorder %s29_s19, %s2018_s20  ;;  %p2024_p2 = scmp.lt.s32.totalorder %s2018_s20, %s2018_s20 }
   0x7   :  { %p2025_p3 = por %p2024_p2, %p2023_p1 }
   0x9   :  { %p2026_p4 = pnand %p2025_p3, %p2019_p0 }
   0xb   :  { %2029 = shalt.err (!%p2026_p4)
}
   0xc   :  { %s2097_s21 = smov 64   ;;  %s2098_s22 = smov 4  }
   0xd   :  { %34 = dma.hbm_to_vmem [thread:$0]  %s2154_s1, 16384, %s29_s19, [#allocation6], %s2097_s21, %s2097_s21, %s2098_s22  }
   0xe   :  { %s2099_s25 = smov [#allocation2]   ;;  %s2100_s27 = smov [#allocation7]  }
   0xf   :  { %s19_s26 = sshll.u32 %s2099_s25, 4  ;;  %s43_s28 = sshll.u32 %s2100_s27, 4  ;;  %s20_s26 = int_to_ptr.vmem [resolvable:$true] %s19_s26  ;;  %s44_s28 = int_to_ptr.vmem [resolvable:$true] %s43_s28 }
  0x10   :  { %s2038_s29 = scalar_lea.vmem %s20_s26, 1024  ;;  %p2043_p6 = scmp.lt.s32.totalorder %s20_s26, %s20_s26 }
  0x11   :  { %p2039_p5 = scmp.ne.s32.totalorder %s20_s26, %s2038_s29  ;;  %p2044_p7 = scmp.lt.s32.totalorder %s2038_s29, %s2038_s29 }
  0x13   :  { %p2045_p8 = por %p2044_p7, %p2043_p6 }
  0x15   :  { %p2046_p9 = pnand %p2045_p8, %p2039_p5 }
  0x17   :  { %2049 = shalt.err (!%p2046_p9)
}
  0x18   :  { %22 = dma.hbm_to_vmem [thread:$0]  %s2153_s0, 1024, %s20_s26, [#allocation3]  }
  0x19   :  { %s2058_s7 = scalar_lea.vmem %s44_s28, 128  ;;  %p2063_p11 = scmp.lt.s32.totalorder %s44_s28, %s44_s28 }
  0x1a   :  { %p2059_p10 = scmp.ne.s32.totalorder %s44_s28, %s2058_s7  ;;  %p2064_p12 = scmp.lt.s32.totalorder %s2058_s7, %s2058_s7 }
  0x1c   :  { %p2065_p13 = por %p2064_p12, %p2063_p11 }
  0x1e   :  { %p2066_p0 = pnand %p2065_p13, %p2059_p10 }
  0x20   :  { %2069 = shalt.err (!%p2066_p0)
}
  0x21   :  { %46 = dma.hbm_to_vmem [thread:$0]  %s2156_s3, 128, %s44_s28, [#allocation6]  }
  0x22   :  { %2090 = dma.done.wait [#allocation3], 1024  }
  0x23   :  { %2091 = vsyncadd [#allocation3], 4294966272 }
  0x24   :  { %2092 = dma.done.wait [#allocation6], 16512  }
  0x25   :  { %2093 = vsyncadd [#allocation6], 4294950784  ;;  %v1866_v0 = vld [vmem:[#allocation5 + $0x78] sm:$0xff]   ;;  %v1870_v4 = vld [vmem:[#allocation5 + $0x70] sm:$0xff]   ;;  %s2104_s10 = smov [#allocation8]  }
  0x26   :  { %v1867_v1 = vld [vmem:[#allocation5 + $0xf8] sm:$0xff]   ;;  %1677 = vmatprep.subr.bf16.mxu0 %v1866_v0  ;;  %v1871_v5 = vld [vmem:[#allocation5 + $0xf0] sm:$0xff]   ;;  %v1874_v8 = vld [vmem:[#allocation5 + $0x68] sm:$0xff]   ;;  %s1521_s11 = sshll.u32 %s2104_s10, 4  ;;  %s1522_s11 = int_to_ptr.vmem [resolvable:$true] %s1521_s11 }
  0x27   :  { %v1868_v2 = vld [vmem:[#allocation5 + $0x38] sm:$0xff]   ;;  %1699 = vmatprep.subr.bf16.mxu1 %v1867_v1  ;;  %v1872_v6 = vld [vmem:[#allocation5 + $0x30] sm:$0xff]   ;;  %v1875_v9 = vld [vmem:[#allocation5 + $0xe8] sm:$0xff]   ;;  %s2070_s12 = scalar_lea.vmem %s1522_s11, 128  ;;  %p2075_p2 = scmp.lt.s32.totalorder %s1522_s11, %s1522_s11 }
  0x28   :  { %v1869_v3 = vld [vmem:[#allocation5 + $0xb8] sm:$0xff]   ;;  %1678 = vmatpush3.bf16.msra.mxu0 %v1868_v2  ;;  %v1873_v7 = vld [vmem:[#allocation5 + $0xb0] sm:$0xff]   ;;  %v1876_v10 = vld [vmem:[#allocation5 + $0x28] sm:$0xff]   ;;  %p2071_p1 = scmp.ne.s32.totalorder %s1522_s11, %s2070_s12  ;;  %p2076_p3 = scmp.lt.s32.totalorder %s2070_s12, %s2070_s12 }
  0x29   :  { %1700 = vmatpush3.bf16.msra.mxu1 %v1869_v3  ;;  %1679 = vmatprep.subr.bf16.mxu0 %v1870_v4  ;;  %v1877_v11 = vld [vmem:[#allocation5 + $0xa8] sm:$0xff]   ;;  %v1878_v12 = vld [vmem:[#allocation5 + $0x60] sm:$0xff]   ;;  %v1882_v16 = vld [vmem:[#allocation5 + $0x58] sm:$0xff]  }
  0x2a   :  { %1701 = vmatprep.subr.bf16.mxu1 %v1871_v5  ;;  %v1879_v13 = vld [vmem:[#allocation5 + $0xe0] sm:$0xff]   ;;  %v1883_v17 = vld [vmem:[#allocation5 + $0xd8] sm:$0xff]   ;;  %v1886_v20 = vld [vmem:[#allocation5 + $0x50] sm:$0xff]   ;;  %p2077_p4 = por %p2076_p3, %p2075_p2 }
  0x2b   :  { %v1880_v14 = vld [vmem:[#allocation5 + $0x20] sm:$0xff]   ;;  %v1884_v18 = vld [vmem:[#allocation5 + $0x18] sm:$0xff]   ;;  %v1887_v21 = vld [vmem:[#allocation5 + $0xd0] sm:$0xff]  }
  0x2c   :  { %1680 = vmatpush3.bf16.msra.mxu0 %v1872_v6  ;;  %v1881_v15 = vld [vmem:[#allocation5 + $0xa0] sm:$0xff]   ;;  %v1885_v19 = vld [vmem:[#allocation5 + $0x98] sm:$0xff]   ;;  %v1888_v22 = vld [vmem:[#allocation5 + $0x10] sm:$0xff]   ;;  %p2078_p5 = pnand %p2077_p4, %p2071_p1 }
  0x2d   :  { %1702 = vmatpush3.bf16.msra.mxu1 %v1873_v7  ;;  %1681 = vmatprep.subr.bf16.mxu0 %v1874_v8  ;;  %v1889_v23 = vld [vmem:[#allocation5 + $0x90] sm:$0xff]   ;;  %v1890_v24 = vld [vmem:[#allocation5 + $0x48] sm:$0xff]   ;;  %v1894_v28 = vld [vmem:[#allocation5 + $0x40] sm:$0xff]  }
  0x2e   :  { %1703 = vmatprep.subr.bf16.mxu1 %v1875_v9  ;;  %v1891_v25 = vld [vmem:[#allocation5 + $0xc8] sm:$0xff]   ;;  %v1895_v29 = vld [vmem:[#allocation5 + $0xc0] sm:$0xff]   ;;  %v1902_v38 = vld [vmem:[#allocation5 + $0x178] sm:$0xff]  }
  0x2f   :  { %v1892_v26 = vld [vmem:[#allocation5 + $0x8] sm:$0xff]   ;;  %v1896_v30 = vld [vmem:[#allocation5] sm:$0xff]   ;;  %v1903_v39 = vld [vmem:[#allocation5 + $0x1f8] sm:$0xff]  }
  0x30   :  { %1682 = vmatpush3.bf16.msra.mxu0 %v1876_v10  ;;  %v1893_v27 = vld [vmem:[#allocation5 + $0x88] sm:$0xff]   ;;  %v1897_v31 = vld [vmem:[#allocation5 + $0x80] sm:$0xff]   ;;  %v1904_v40 = vld [vmem:[#allocation5 + $0x138] sm:$0xff]  }
  0x31   :  { %1704 = vmatpush3.bf16.msra.mxu1 %v1877_v11  ;;  %1683 = vmatprep.subr.bf16.mxu0 %v1878_v12  ;;  %v59_v32 = vld [vmem:[#allocation2] sm:$0xff]  ;;  %v60_v33 = vld [vmem:[#allocation2 + $0x8] sm:$0xff]  ;;  %v1905_v41 = vld [vmem:[#allocation5 + $0x1b8] sm:$0xff]  }
  0x32   :  { %1705 = vmatprep.subr.bf16.mxu1 %v1879_v13  ;;  %v1532_v34 = vcombine.low %v59_v32, %v59_v32  ;;  %v1533_v35 = vcombine.high %v59_v32, %v59_v32  ;;  %v1534_v36 = vcombine.low %v60_v33, %v60_v33  ;;  %v1535_v37 = vcombine.high %v60_v33, %v60_v33  ;;  %v1906_v42 = vld [vmem:[#allocation5 + $0x170] sm:$0xff]   ;;  %v1910_v46 = vld [vmem:[#allocation5 + $0x168] sm:$0xff]   ;;  %v1914_v50 = vld [vmem:[#allocation5 + $0x160] sm:$0xff]  }
  0x33   :  { %v1907_v43 = vld [vmem:[#allocation5 + $0x1f0] sm:$0xff]   ;;  %v1911_v47 = vld [vmem:[#allocation5 + $0x1e8] sm:$0xff]   ;;  %v1915_v51 = vld [vmem:[#allocation5 + $0x1e0] sm:$0xff]  }
  0x34   :  { %1684 = vmatpush3.bf16.msra.mxu0 %v1880_v14  ;;  %1186 = vmatprep.mubr.bf16.mxu0 %v1533_v35  ;;  %v1908_v44 = vld [vmem:[#allocation5 + $0x130] sm:$0xff]   ;;  %v1912_v48 = vld [vmem:[#allocation5 + $0x128] sm:$0xff]   ;;  %v1916_v52 = vld [vmem:[#allocation5 + $0x120] sm:$0xff]  }
  0x35   :  { %1706 = vmatpush3.bf16.msra.mxu1 %v1881_v15  ;;  %1685 = vmatprep.subr.bf16.mxu0 %v1882_v16  ;;  %v1909_v45 = vld [vmem:[#allocation5 + $0x1b0] sm:$0xff]   ;;  %v1913_v49 = vld [vmem:[#allocation5 + $0x1a8] sm:$0xff]   ;;  %v1917_v53 = vld [vmem:[#allocation5 + $0x1a0] sm:$0xff]  }
  0x36   :  { %1707 = vmatprep.subr.bf16.mxu1 %v1883_v17  ;;  %1226 = vmatprep.mubr.bf16.mxu1 %v1535_v37  ;;  %v1918_v54 = vld [vmem:[#allocation5 + $0x158] sm:$0xff]   ;;  %v1922_v58 = vld [vmem:[#allocation5 + $0x150] sm:$0xff]   ;;  %v1926_v62 = vld [vmem:[#allocation5 + $0x148] sm:$0xff]  }
  0x37   :  { %v1919_v55 = vld [vmem:[#allocation5 + $0x1d8] sm:$0xff]   ;;  %v1923_v59 = vld [vmem:[#allocation5 + $0x1d0] sm:$0xff]   ;;  %v1927_v63 = vld [vmem:[#allocation5 + $0x1c8] sm:$0xff]  }
  0x38   :  { %1686 = vmatpush3.bf16.msra.mxu0 %v1884_v18  ;;  %v1920_v56 = vld [vmem:[#allocation5 + $0x118] sm:$0xff]   ;;  %v1924_v60 = vld [vmem:[#allocation5 + $0x110] sm:$0xff]   ;;  %v1928_v0 = vld [vmem:[#allocation5 + $0x108] sm:$0xff]  }
  0x39   :  { %1708 = vmatpush3.bf16.msra.mxu1 %v1885_v19  ;;  %1687 = vmatprep.subr.bf16.mxu0 %v1886_v20  ;;  %v1921_v57 = vld [vmem:[#allocation5 + $0x198] sm:$0xff]   ;;  %v1925_v61 = vld [vmem:[#allocation5 + $0x190] sm:$0xff]   ;;  %v1929_v1 = vld [vmem:[#allocation5 + $0x188] sm:$0xff]  }
  0x3a   :  { %1709 = vmatprep.subr.bf16.mxu1 %v1887_v21  ;;  %v1930_v2 = vld [vmem:[#allocation5 + $0x140] sm:$0xff]   ;;  %v61_v6 = vld [vmem:[#allocation2 + $0x10] sm:$0xff]  ;;  %v62_v9 = vld [vmem:[#allocation2 + $0x18] sm:$0xff] }
  0x3b   :  { %v1931_v3 = vld [vmem:[#allocation5 + $0x1c0] sm:$0xff]   ;;  %v1536_v7 = vcombine.low %v61_v6, %v61_v6  ;;  %v1537_v8 = vcombine.high %v61_v6, %v61_v6  ;;  %v1538_v10 = vcombine.low %v62_v9, %v62_v9  ;;  %v1539_v11 = vcombine.high %v62_v9, %v62_v9  ;;  %v1938_v12 = vld [vmem:[#allocation5 + $0x278] sm:$0xff]   ;;  %v1942_v16 = vld [vmem:[#allocation5 + $0x270] sm:$0xff]  }
  0x3c   :  { %1688 = vmatpush3.bf16.msra.mxu0 %v1888_v22  ;;  %v1932_v4 = vld [vmem:[#allocation5 + $0x100] sm:$0xff]   ;;  %v1939_v13 = vld [vmem:[#allocation5 + $0x2f8] sm:$0xff]   ;;  %v1943_v17 = vld [vmem:[#allocation5 + $0x2f0] sm:$0xff]  }
  0x3d   :  { %1710 = vmatpush3.bf16.msra.mxu1 %v1889_v23  ;;  %1689 = vmatprep.subr.bf16.mxu0 %v1890_v24  ;;  %v1933_v5 = vld [vmem:[#allocation5 + $0x180] sm:$0xff]   ;;  %v1940_v14 = vld [vmem:[#allocation5 + $0x238] sm:$0xff]   ;;  %v1944_v18 = vld [vmem:[#allocation5 + $0x230] sm:$0xff]  }
  0x3e   :  { %1711 = vmatprep.subr.bf16.mxu1 %v1891_v25  ;;  %v1941_v15 = vld [vmem:[#allocation5 + $0x2b8] sm:$0xff]   ;;  %v1945_v19 = vld [vmem:[#allocation5 + $0x2b0] sm:$0xff]   ;;  %v1946_v20 = vld [vmem:[#allocation5 + $0x268] sm:$0xff]  }
  0x3f   :  { %v1947_v21 = vld [vmem:[#allocation5 + $0x2e8] sm:$0xff]   ;;  %v1950_v24 = vld [vmem:[#allocation5 + $0x260] sm:$0xff]   ;;  %v1958_v32 = vld [vmem:[#allocation5 + $0x250] sm:$0xff]  }
  0x40   :  { %1690 = vmatpush3.bf16.msra.mxu0 %v1892_v26  ;;  %v1948_v22 = vld [vmem:[#allocation5 + $0x228] sm:$0xff]   ;;  %v1951_v25 = vld [vmem:[#allocation5 + $0x2e0] sm:$0xff]   ;;  %v1959_v33 = vld [vmem:[#allocation5 + $0x2d0] sm:$0xff]  }
  0x41   :  { %1712 = vmatpush3.bf16.msra.mxu1 %v1893_v27  ;;  %1691 = vmatprep.subr.bf16.mxu0 %v1894_v28  ;;  %v1949_v23 = vld [vmem:[#allocation5 + $0x2a8] sm:$0xff]   ;;  %v1952_v26 = vld [vmem:[#allocation5 + $0x220] sm:$0xff]   ;;  %v1954_v28 = vld [vmem:[#allocation5 + $0x258] sm:$0xff]  }
  0x42   :  { %1713 = vmatprep.subr.bf16.mxu1 %v1895_v29  ;;  %v1953_v27 = vld [vmem:[#allocation5 + $0x2a0] sm:$0xff]   ;;  %v1955_v29 = vld [vmem:[#allocation5 + $0x2d8] sm:$0xff]   ;;  %v1961_v35 = vld [vmem:[#allocation5 + $0x290] sm:$0xff]  }
  0x43   :  { %v1963_v37 = vld [vmem:[#allocation5 + $0x2c8] sm:$0xff]   ;;  %v1994_v6 = vld [vmem:[#allocation5 + $0x350] sm:$0xff]  }
  0x44   :  { %1692 = vmatpush3.bf16.msra.mxu0 %v1896_v30  ;;  %v1956_v30 = vld [vmem:[#allocation5 + $0x218] sm:$0xff]   ;;  %v1997_v9 = vld [vmem:[#allocation5 + $0x390] sm:$0xff]  }
  0x45   :  { %1714 = vmatpush3.bf16.msra.mxu1 %v1897_v31  ;;  %1721 = vmatprep.subr.bf16.mxu0 %v1902_v38  ;;  %v1957_v31 = vld [vmem:[#allocation5 + $0x298] sm:$0xff]   ;;  %v1964_v38 = vld [vmem:[#allocation5 + $0x208] sm:$0xff]  }
  0x46   :  { %1743 = vmatprep.subr.bf16.mxu1 %v1903_v39  ;;  %v1965_v39 = vld [vmem:[#allocation5 + $0x288] sm:$0xff]  }
  0x47   :  { %1187 = vmatmul.mubr.bf16.vlgmr.msra.gmra.mxu0 %v1532_v34  ;;  %v1960_v34 = vld [vmem:[#allocation5 + $0x210] sm:$0xff]  }
  0x48   :  { %1227 = vmatmul.mubr.bf16.vlgmr.msra.gmra.mxu1 %v1534_v36  ;;  %1722 = vmatpush3.bf16.msra.mxu0 %v1904_v40  ;;  %v1962_v36 = vld [vmem:[#allocation5 + $0x248] sm:$0xff]   ;;  %v1966_v40 = vld [vmem:[#allocation5 + $0x240] sm:$0xff]  }
  0x49   :  { %1744 = vmatpush3.bf16.msra.mxu1 %v1905_v41  ;;  %1723 = vmatprep.subr.bf16.mxu0 %v1906_v42  ;;  %v1967_v41 = vld [vmem:[#allocation5 + $0x2c0] sm:$0xff]  }
  0x4a   :  { %1745 = vmatprep.subr.bf16.mxu1 %v1907_v43  ;;  %1266 = vmatprep.mubr.bf16.mxu0 %v1537_v8  ;;  %v1968_v42 = vld [vmem:[#allocation5 + $0x200] sm:$0xff]   ;;  %v1996_v8 = vld [vmem:[#allocation5 + $0x310] sm:$0xff]  }
  0x4b   :  { %1306 = vmatprep.mubr.bf16.mxu1 %v1539_v11  ;;  %v1969_v43 = vld [vmem:[#allocation5 + $0x280] sm:$0xff]   ;;  %v1999_v11 = vld [vmem:[#allocation5 + $0x3c8] sm:$0xff]  }
  0x4c   :  { %1724 = vmatpush3.bf16.msra.mxu0 %v1908_v44  ;;  %v63_v44 = vld [vmem:[#allocation2 + $0x20] sm:$0xff] }
  0x4d   :  { %1746 = vmatpush3.bf16.msra.mxu1 %v1909_v45  ;;  %1725 = vmatprep.subr.bf16.mxu0 %v1910_v46  ;;  %v64_v45 = vld [vmem:[#allocation2 + $0x28] sm:$0xff]  ;;  %v1540_v46 = vcombine.low %v63_v44, %v63_v44 }
  0x4e   :  { %1747 = vmatprep.subr.bf16.mxu1 %v1911_v47  ;;  %v1541_v47 = vcombine.high %v63_v44, %v63_v44 }
  0x50   :  { %1726 = vmatpush3.bf16.msra.mxu0 %v1912_v48  ;;  %v1542_v48 = vcombine.low %v64_v45, %v64_v45 }
  0x51   :  { %1748 = vmatpush3.bf16.msra.mxu1 %v1913_v49  ;;  %1727 = vmatprep.subr.bf16.mxu0 %v1914_v50  ;;  %v1543_v49 = vcombine.high %v64_v45, %v64_v45  ;;  %v1974_v50 = vld [vmem:[#allocation5 + $0x378] sm:$0xff]  }
  0x52   :  { %1749 = vmatprep.subr.bf16.mxu1 %v1915_v51  ;;  %v1975_v51 = vld [vmem:[#allocation5 + $0x3f8] sm:$0xff]  }
  0x54   :  { %1728 = vmatpush3.bf16.msra.mxu0 %v1916_v52  ;;  %v1976_v52 = vld [vmem:[#allocation5 + $0x338] sm:$0xff]  }
  0x55   :  { %1750 = vmatpush3.bf16.msra.mxu1 %v1917_v53  ;;  %1729 = vmatprep.subr.bf16.mxu0 %v1918_v54  ;;  %v1977_v53 = vld [vmem:[#allocation5 + $0x3b8] sm:$0xff]   ;;  %v1978_v54 = vld [vmem:[#allocation5 + $0x370] sm:$0xff]  }
  0x56   :  { %1751 = vmatprep.subr.bf16.mxu1 %v1919_v55  ;;  %v1979_v55 = vld [vmem:[#allocation5 + $0x3f0] sm:$0xff]  }
  0x58   :  { %1730 = vmatpush3.bf16.msra.mxu0 %v1920_v56  ;;  %v1980_v56 = vld [vmem:[#allocation5 + $0x330] sm:$0xff]  }
  0x59   :  { %1752 = vmatpush3.bf16.msra.mxu1 %v1921_v57  ;;  %1731 = vmatprep.subr.bf16.mxu0 %v1922_v58  ;;  %v1981_v57 = vld [vmem:[#allocation5 + $0x3b0] sm:$0xff]   ;;  %v1982_v58 = vld [vmem:[#allocation5 + $0x368] sm:$0xff]  }
  0x5a   :  { %1753 = vmatprep.subr.bf16.mxu1 %v1923_v59  ;;  %v1983_v59 = vld [vmem:[#allocation5 + $0x3e8] sm:$0xff]  }
  0x5c   :  { %1732 = vmatpush3.bf16.msra.mxu0 %v1924_v60  ;;  %v1984_v60 = vld [vmem:[#allocation5 + $0x328] sm:$0xff]  }
  0x5d   :  { %1754 = vmatpush3.bf16.msra.mxu1 %v1925_v61  ;;  %1733 = vmatprep.subr.bf16.mxu0 %v1926_v62  ;;  %v1985_v61 = vld [vmem:[#allocation5 + $0x3a8] sm:$0xff]   ;;  %v1986_v62 = vld [vmem:[#allocation5 + $0x360] sm:$0xff]  }
  0x5e   :  { %1755 = vmatprep.subr.bf16.mxu1 %v1927_v63  ;;  %v1987_v63 = vld [vmem:[#allocation5 + $0x3e0] sm:$0xff]  }
  0x60   :  { %1734 = vmatpush3.bf16.msra.mxu0 %v1928_v0  ;;  %v1988_v0 = vld [vmem:[#allocation5 + $0x320] sm:$0xff]  }
  0x61   :  { %1756 = vmatpush3.bf16.msra.mxu1 %v1929_v1  ;;  %1735 = vmatprep.subr.bf16.mxu0 %v1930_v2  ;;  %v1989_v1 = vld [vmem:[#allocation5 + $0x3a0] sm:$0xff]   ;;  %v1990_v2 = vld [vmem:[#allocation5 + $0x358] sm:$0xff]  }
  0x62   :  { %1757 = vmatprep.subr.bf16.mxu1 %v1931_v3  ;;  %v1991_v3 = vld [vmem:[#allocation5 + $0x3d8] sm:$0xff]  }
  0x64   :  { %1736 = vmatpush3.bf16.msra.mxu0 %v1932_v4  ;;  %v1992_v4 = vld [vmem:[#allocation5 + $0x318] sm:$0xff]  }
  0x65   :  { %1758 = vmatpush3.bf16.msra.mxu1 %v1933_v5  ;;  %1765 = vmatprep.subr.bf16.mxu0 %v1938_v12  ;;  %v1993_v5 = vld [vmem:[#allocation5 + $0x398] sm:$0xff]   ;;  %v2000_v12 = vld [vmem:[#allocation5 + $0x308] sm:$0xff]  }
  0x66   :  { %1787 = vmatprep.subr.bf16.mxu1 %v1939_v13  ;;  %v2001_v13 = vld [vmem:[#allocation5 + $0x388] sm:$0xff]  }
  0x67   :  { %1267 = vmatmul.mubr.bf16.vlgmr.msra.gmra.mxu0 %v1536_v7  ;;  %v1995_v7 = vld [vmem:[#allocation5 + $0x3d0] sm:$0xff]  }
  0x68   :  { %1307 = vmatmul.mubr.bf16.vlgmr.msra.gmra.mxu1 %v1538_v10  ;;  %1766 = vmatpush3.bf16.msra.mxu0 %v1940_v14  ;;  %v1998_v10 = vld [vmem:[#allocation5 + $0x348] sm:$0xff]   ;;  %v2002_v14 = vld [vmem:[#allocation5 + $0x340] sm:$0xff]  }
  0x69   :  { %1788 = vmatpush3.bf16.msra.mxu1 %v1941_v15  ;;  %1767 = vmatprep.subr.bf16.mxu0 %v1942_v16  ;;  %v2003_v15 = vld [vmem:[#allocation5 + $0x3c0] sm:$0xff]  }
  0x6a   :  { %1789 = vmatprep.subr.bf16.mxu1 %v1943_v17  ;;  %1346 = vmatprep.mubr.bf16.mxu0 %v1541_v47  ;;  %v2004_v16 = vld [vmem:[#allocation5 + $0x300] sm:$0xff]  }
  0x6b   :  { %1386 = vmatprep.mubr.bf16.mxu1 %v1543_v49  ;;  %v2005_v17 = vld [vmem:[#allocation5 + $0x380] sm:$0xff]  }
  0x6c   :  { %1768 = vmatpush3.bf16.msra.mxu0 %v1944_v18  ;;  %v65_v18 = vld [vmem:[#allocation2 + $0x30] sm:$0xff] }
  0x6d   :  { %1790 = vmatpush3.bf16.msra.mxu1 %v1945_v19  ;;  %1769 = vmatprep.subr.bf16.mxu0 %v1946_v20  ;;  %v66_v19 = vld [vmem:[#allocation2 + $0x38] sm:$0xff]  ;;  %v1544_v20 = vcombine.low %v65_v18, %v65_v18 }
  0x6e   :  { %1791 = vmatprep.subr.bf16.mxu1 %v1947_v21  ;;  %v1545_v21 = vcombine.high %v65_v18, %v65_v18 }
  0x70   :  { %1770 = vmatpush3.bf16.msra.mxu0 %v1948_v22  ;;  %v1546_v22 = vcombine.low %v66_v19, %v66_v19 }
  0x71   :  { %1792 = vmatpush3.bf16.msra.mxu1 %v1949_v23  ;;  %1771 = vmatprep.subr.bf16.mxu0 %v1950_v24  ;;  %v1547_v23 = vcombine.high %v66_v19, %v66_v19  ;;  %v2101_v24 = vmov 2  }
  0x72   :  { %1793 = vmatprep.subr.bf16.mxu1 %v1951_v25  ;;  %1864 = vset.pattern.permute.xlu1 %v2101_v24  ;;  %v2102_v25 = vmov 0  }
  0x73   :  { %1862 = vset.pattern.permute.xlu0 %v2102_v25 }
  0x74   :  { %1772 = vmatpush3.bf16.msra.mxu0 %v1952_v26 }
  0x75   :  { %1794 = vmatpush3.bf16.msra.mxu1 %v1953_v27  ;;  %1773 = vmatprep.subr.bf16.mxu0 %v1954_v28  ;;  %v1531_v28 = vld [vmem:[%s2155_s2] ss:$0 sm:$0xff] }
  0x76   :  { %1795 = vmatprep.subr.bf16.mxu1 %v1955_v29 }
  0x78   :  { %1774 = vmatpush3.bf16.msra.mxu0 %v1956_v30 }
  0x79   :  { %1796 = vmatpush3.bf16.msra.mxu1 %v1957_v31  ;;  %1775 = vmatprep.subr.bf16.mxu0 %v1958_v32 }
  0x7a   :  { %1797 = vmatprep.subr.bf16.mxu1 %v1959_v33 }
  0x7c   :  { %1776 = vmatpush3.bf16.msra.mxu0 %v1960_v34 }
  0x7d   :  { %1798 = vmatpush3.bf16.msra.mxu1 %v1961_v35  ;;  %1777 = vmatprep.subr.bf16.mxu0 %v1962_v36 }
  0x7e   :  { %1799 = vmatprep.subr.bf16.mxu1 %v1963_v37 }
  0x80   :  { %1778 = vmatpush3.bf16.msra.mxu0 %v1964_v38 }
  0x81   :  { %1800 = vmatpush3.bf16.msra.mxu1 %v1965_v39  ;;  %1779 = vmatprep.subr.bf16.mxu0 %v1966_v40 }
  0x82   :  { %1801 = vmatprep.subr.bf16.mxu1 %v1967_v41 }
  0x84   :  { %1780 = vmatpush3.bf16.msra.mxu0 %v1968_v42 }
  0x85   :  { %1802 = vmatpush3.bf16.msra.mxu1 %v1969_v43  ;;  %1809 = vmatprep.subr.bf16.mxu0 %v1974_v50 }
  0x86   :  { %1831 = vmatprep.subr.bf16.mxu1 %v1975_v51 }
  0x87   :  { %1347 = vmatmul.mubr.bf16.vlgmr.msra.gmra.mxu0 %v1540_v46 }
  0x88   :  { %1387 = vmatmul.mubr.bf16.vlgmr.msra.gmra.mxu1 %v1542_v48  ;;  %1810 = vmatpush3.bf16.msra.mxu0 %v1976_v52 }
  0x89   :  { %1832 = vmatpush3.bf16.msra.mxu1 %v1977_v53  ;;  %1811 = vmatprep.subr.bf16.mxu0 %v1978_v54 }
  0x8a   :  { %1833 = vmatprep.subr.bf16.mxu1 %v1979_v55  ;;  %1426 = vmatprep.mubr.bf16.mxu0 %v1545_v21 }
  0x8b   :  { %1466 = vmatprep.mubr.bf16.mxu1 %v1547_v23 }
  0x8c   :  { %1812 = vmatpush3.bf16.msra.mxu0 %v1980_v56 }
  0x8d   :  { %1834 = vmatpush3.bf16.msra.mxu1 %v1981_v57  ;;  %1813 = vmatprep.subr.bf16.mxu0 %v1982_v58 }
  0x8e   :  { %1835 = vmatprep.subr.bf16.mxu1 %v1983_v59 }
  0x90   :  { %1814 = vmatpush3.bf16.msra.mxu0 %v1984_v60 }
  0x91   :  { %1836 = vmatpush3.bf16.msra.mxu1 %v1985_v61  ;;  %1815 = vmatprep.subr.bf16.mxu0 %v1986_v62 }
  0x92   :  { %1837 = vmatprep.subr.bf16.mxu1 %v1987_v63 }
  0x94   :  { %1816 = vmatpush3.bf16.msra.mxu0 %v1988_v0 }
  0x95   :  { %1838 = vmatpush3.bf16.msra.mxu1 %v1989_v1  ;;  %1817 = vmatprep.subr.bf16.mxu0 %v1990_v2 }
  0x96   :  { %1839 = vmatprep.subr.bf16.mxu1 %v1991_v3 }
  0x98   :  { %1818 = vmatpush3.bf16.msra.mxu0 %v1992_v4 }
  0x99   :  { %1840 = vmatpush3.bf16.msra.mxu1 %v1993_v5  ;;  %1819 = vmatprep.subr.bf16.mxu0 %v1994_v6 }
  0x9a   :  { %1841 = vmatprep.subr.bf16.mxu1 %v1995_v7 }
  0x9c   :  { %1820 = vmatpush3.bf16.msra.mxu0 %v1996_v8 }
  0x9d   :  { %1842 = vmatpush3.bf16.msra.mxu1 %v1997_v9  ;;  %1821 = vmatprep.subr.bf16.mxu0 %v1998_v10 }
  0x9e   :  { %1843 = vmatprep.subr.bf16.mxu1 %v1999_v11 }
  0xa0   :  { %1822 = vmatpush3.bf16.msra.mxu0 %v2000_v12  ;;  %v2103_v12 = vmov 1  }
  0xa1   :  { %1844 = vmatpush3.bf16.msra.mxu1 %v2001_v13  ;;  %1823 = vmatprep.subr.bf16.mxu0 %v2002_v14  ;;  %v1481_v13 = vlaneseq }
  0xa2   :  { %1845 = vmatprep.subr.bf16.mxu1 %v2003_v15 }
  0xa3   :  { %v1482_v14 = vshrl.u32 %v1481_v13, 7 }
  0xa4   :  { %1824 = vmatpush3.bf16.msra.mxu0 %v2004_v16 }
  0xa5   :  { %1846 = vmatpush3.bf16.msra.mxu1 %v2005_v17  ;;  %v1483_v15 = vsub.s32 0, %v1482_v14  ;;  %v1492_v16 = vsub.s32 1, %v1482_v14  ;;  %v1475_v17 = vld [vmem:[#allocation7] sm:$0xff]  ;;  %v1502_v18 = vsub.s32 2, %v1482_v14 }
  0xa7   :  { %1427 = vmatmul.mubr.bf16.vlgmr.msra.gmra.mxu0 %v1544_v20  ;;  %v1484_v20 = vrot.slane %v1475_v17, %v1483_v15  ;;  %v1493_v21 = vrot.slane %v1475_v17, %v1492_v16 }
  0xa8   :  { %1467 = vmatmul.mubr.bf16.vlgmr.msra.gmra.mxu1 %v1546_v22  ;;  %v1503_v22 = vrot.slane %v1475_v17, %v1502_v18 }
 0x107   :  { %v1693_v26 = vpop.f32.mrf.mxu0 }
 0x108   :  { %v1715_v27 = vpop.f32.mrf.mxu1 }
 0x109   :  { %v1694_v29 = vpop.f32.mrf.mxu0 }
 0x10a   :  { %v1716_v30 = vpop.f32.mrf.mxu1  ;;  %v1695_v31 = vadd.f32 %v1694_v29, %v1693_v26 }
 0x10b   :  { %v1717_v32 = vadd.f32 %v1716_v30, %v1715_v27  ;;  %v1696_v33 = vpop.f32.mrf.mxu0 }
 0x10c   :  { %v1718_v34 = vpop.f32.mrf.mxu1  ;;  %v1189_v35 = vadd.f32 %v1695_v31, %v1531_v28 }
 0x10d   :  { %v1697_v36 = vpop.f32.mrf.mxu0 }
 0x10e   :  { %v1719_v37 = vpop.f32.mrf.mxu1  ;;  %v1229_v38 = vadd.f32 %v1717_v32, %v1189_v35 }
 0x127   :  { %v1737_v39 = vpop.f32.mrf.mxu0 }
 0x128   :  { %v1759_v40 = vpop.f32.mrf.mxu1 }
 0x129   :  { %v1738_v41 = vpop.f32.mrf.mxu0 }
 0x12a   :  { %v1760_v42 = vpop.f32.mrf.mxu1  ;;  %v1739_v55 = vadd.f32 %v1738_v41, %v1737_v39 }
 0x12b   :  { %v1740_v43 = vpop.f32.mrf.mxu0  ;;  %v1761_v57 = vadd.f32 %v1760_v42, %v1759_v40 }
 0x12c   :  { %v1762_v44 = vpop.f32.mrf.mxu1  ;;  %v1269_v56 = vadd.f32 %v1739_v55, %v1229_v38 }
 0x12d   :  { %v1741_v45 = vpop.f32.mrf.mxu0 }
 0x12e   :  { %v1763_v46 = vpop.f32.mrf.mxu1  ;;  %v1309_v59 = vadd.f32 %v1761_v57, %v1269_v56 }
 0x147   :  { %v1781_v47 = vpop.f32.mrf.mxu0 }
 0x148   :  { %v1803_v48 = vpop.f32.mrf.mxu1 }
 0x149   :  { %v1782_v49 = vpop.f32.mrf.mxu0 }
 0x14a   :  { %v1804_v50 = vpop.f32.mrf.mxu1  ;;  %v1783_v58 = vadd.f32 %v1782_v49, %v1781_v47 }
 0x14b   :  { %v1784_v51 = vpop.f32.mrf.mxu0  ;;  %v1805_v61 = vadd.f32 %v1804_v50, %v1803_v48 }
 0x14c   :  { %v1806_v52 = vpop.f32.mrf.mxu1  ;;  %v1349_v60 = vadd.f32 %v1783_v58, %v1309_v59 }
 0x14d   :  { %v1785_v53 = vpop.f32.mrf.mxu0 }
 0x14e   :  { %v1807_v54 = vpop.f32.mrf.mxu1  ;;  %v1389_v1 = vadd.f32 %v1805_v61, %v1349_v60 }
 0x167   :  { %v1825_v62 = vpop.f32.mrf.mxu0 }
 0x168   :  { %v1847_v63 = vpop.f32.mrf.mxu1 }
 0x169   :  { %v1826_v0 = vpop.f32.mrf.mxu0 }
 0x16a   :  { %v1827_v2 = vadd.f32 %v1826_v0, %v1825_v62  ;;  %v1848_v3 = vpop.f32.mrf.mxu1 }
 0x16b   :  { %v1828_v4 = vpop.f32.mrf.mxu0  ;;  %v1849_v6 = vadd.f32 %v1848_v3, %v1847_v63 }
 0x16c   :  { %v1429_v5 = vadd.f32 %v1827_v2, %v1389_v1  ;;  %v1850_v7 = vpop.f32.mrf.mxu1 }
 0x16d   :  { %v1829_v8 = vpop.f32.mrf.mxu0 }
 0x16e   :  { %v1469_v9 = vadd.f32 %v1849_v6, %v1429_v5  ;;  %v1851_v10 = vpop.f32.mrf.mxu1 }
 0x170   :  { %v1474_v11 = vmax.f32 %v1469_v9, 0.0 }
 0x172   :  { %1497 = vperm.xlu1 %1864, %v1474_v11   ;;  %1478 = vperm.xlu0 %1862, %v1474_v11  }
 0x176   :  { %1863 = vset.pattern.permute.xlu0 %v2103_v12 }
 0x177   :  { %1487 = vperm.xlu0 %1863, %v1474_v11  }
 0x17b   :  { %1865 = vset.pattern.permute.xlu0 %v2101_v24  ;;  %v1676_v24 = vld [vmem:[%s2157_s4] ss:$0 sm:$0xff] }
 0x1ed   :  { %v1479_v19 = vpop.permute.xlu0 %1478  ;;  %v1498_v23 = vpop.permute.xlu1 %1497 }
 0x1ee   :  { %v1485_v26 = vmul.f32 %v1484_v20, %v1479_v19  ;;  %v1504_v28 = vmul.f32 %v1503_v22, %v1498_v23 }
 0x1f2   :  { %v1488_v25 = vpop.permute.xlu0 %1487 }
 0x1f3   :  { %v1494_v27 = vmul.f32 %v1493_v21, %v1488_v25 }
 0x1f5   :  { %v1495_v29 = vadd.f32 %v1494_v27, %v1485_v26 }
 0x1f7   :  { %v1505_v30 = vadd.f32 %v1504_v28, %v1495_v29 }
 0x1f9   :  { %v1513_v31 = vadd.f32 %v1676_v24, %v1505_v30 }
 0x1fb   :  { %1514 = vst [vmem:[#allocation8] sm:$0xff] %v1513_v31 }
 0x1fc   :  { %2081 = shalt.err (!%p2078_p5)
}
 0x1fd   :  { %1524 = dma.vmem_to_hbm [thread:$0]  %s1522_s11, 128, %s2158_s5, [#allocation4]  }
 0x1fe   :  { %2094 = dma.done.wait [#allocation4], 128  }
 0x1ff   :  { %2095 = vsyncadd [#allocation4], 4294967168 }
 0x200   :  { %1528 = vsyncpa [#allocation3], 1 }
 0x201   :  { %1529 = vsyncpa [#allocation6], 1 }
 0x202   :  { %1530 = vsyncpa [#allocation4], 1 }

</bundles_post_ra>
